<compile_context>
chip_gen: v6e
topology: v6e:2x2x1
jax: 0.10.0
libtpu: 0.0.40
codegen_flags: <defaults>
</compile_context>

<pallas_src>
import functools
import math

import jax
import jax.numpy as jnp
from jax.experimental import pallas as pl
from jax.experimental.pallas import tpu as pltpu


def _round_up(x, m):
    return ((x + m - 1) // m) * m


def _mlp_kernel(x_ref, w1_ref, b1_ref, w2_ref, b2_ref, o_ref):
    # x_ref : (TM, D_in)       bf16 tile of flattened inputs (pipelined)
    # w1_ref: (D_in, H)        bf16 pre_net weight  (resident, full)
    # b1_ref: (1, H)           f32  pre_net bias
    # w2_ref: (H, D_out_pad)   bf16 post_net weight (zero-padded to 128 lanes)
    # b2_ref: (1, D_out_pad)   f32  post_net bias   (zero-padded)
    # o_ref : (TM, D_out_pad)  f32  output tile
    h = jnp.dot(x_ref[...], w1_ref[...], preferred_element_type=jnp.float32)
    h = jnp.maximum(h + b1_ref[...], 0.0)                 # bias + ReLU on the VPU
    out = jnp.dot(h.astype(jnp.bfloat16), w2_ref[...],
                  preferred_element_type=jnp.float32)
    o_ref[...] = (out + b2_ref[...]).astype(o_ref.dtype)


def base_model_forward(x, w1, b1, w2, b2, *, tm=512):
    """x: (B, T, D_in) float32.  Returns (B, T, D_out) float32."""
    B, T, D_in = x.shape
    H = w1.shape[1]
    D_out = w2.shape[1]
    D_out_pad = _round_up(max(D_out, 128), 128)           # lane-dense output width

    M = B * T
    tm_eff = min(tm, M)                                   # never exceed the row count
    grid = (pl.cdiv(M, tm_eff),)                          # partial last block is masked

    # bf16 operands for the MXU; f32 biases added after f32 accumulation.
    x2 = x.reshape(M, D_in).astype(jnp.bfloat16)
    w1b = w1.astype(jnp.bfloat16)
    w2b = jnp.pad(w2, ((0, 0), (0, D_out_pad - D_out))).astype(jnp.bfloat16)
    b1f = b1.reshape(1, H).astype(jnp.float32)
    b2f = jnp.pad(b2.reshape(1, D_out),
                  ((0, 0), (0, D_out_pad - D_out))).astype(jnp.float32)

    cost = pl.CostEstimate(
        flops=2 * M * (D_in * H + H * D_out_pad),
        transcendentals=0,
        bytes_accessed=(M * D_in * 2 + D_in * H * 2 + H * D_out_pad * 2
                        + (H + D_out_pad) * 4 + M * D_out_pad * 4),
    )

    out = pl.pallas_call(
        _mlp_kernel,
        out_shape=jax.ShapeDtypeStruct((M, D_out_pad), jnp.float32),
        grid_spec=pltpu.PrefetchScalarGridSpec(
            num_scalar_prefetch=0,
            grid=grid,
            in_specs=[
                pl.BlockSpec((tm_eff, D_in), lambda i: (i, 0)),    # x tile (pipelined)
                pl.BlockSpec((D_in, H), lambda i: (0, 0)),         # W1 (resident)
                pl.BlockSpec((1, H), lambda i: (0, 0)),            # b1
                pl.BlockSpec((H, D_out_pad), lambda i: (0, 0)),    # W2 (resident)
                pl.BlockSpec((1, D_out_pad), lambda i: (0, 0)),    # b2
            ],
            out_specs=pl.BlockSpec((tm_eff, D_out_pad), lambda i: (i, 0)),
        ),
        compiler_params=pltpu.CompilerParams(
            dimension_semantics=("parallel",),   # megacore-shardable
            vmem_limit_bytes=32 << 20,           # headroom for double-buffered tiles
        ),
        cost_estimate=cost,
    )(x2, w1b, b1f, w2b, b2f)

    return out[:, :D_out].reshape(B, T, D_out)


def init_params(key, input_dim=768, hidden_dim=256, output_dim=5):
    """Deterministic synthetic init matching nn.Linear's shapes.

    PyTorch nn.Linear(in, out) has weight (out, in), bias (out,); we store the
    transposed weight (in, out) so the kernel multiplies without a transpose.
    Init mimics PyTorch's U(-1/sqrt(fan_in), 1/sqrt(fan_in)).
    """
    k1, k2, k3, k4 = jax.random.split(key, 4)
    lim1 = 1.0 / math.sqrt(input_dim)
    lim2 = 1.0 / math.sqrt(hidden_dim)
    w1 = jax.random.uniform(k1, (input_dim, hidden_dim), jnp.float32, -lim1, lim1)
    b1 = jax.random.uniform(k2, (1, hidden_dim), jnp.float32, -lim1, lim1)
    w2 = jax.random.uniform(k3, (hidden_dim, output_dim), jnp.float32, -lim2, lim2)
    b2 = jax.random.uniform(k4, (1, output_dim), jnp.float32, -lim2, lim2)
    return w1, b1, w2, b2


if __name__ == "__main__":
    key = jax.random.PRNGKey(0)
    k_x, k_p = jax.random.split(key)

    # Small but forward-consistent shapes: batch=2, seq=8, input_dim=768 -> 5.
    B, T, D_IN, H, D_OUT = 2, 8, 768, 256, 5
    x = jax.random.normal(k_x, (B, T, D_IN), jnp.float32)
    w1, b1, w2, b2 = init_params(k_p, D_IN, H, D_OUT)

    fwd = jax.jit(functools.partial(base_model_forward, tm=512))
    out = fwd(x, w1, b1, w2, b2)
    jax.block_until_ready(out)

    # Pure-JAX reference mirroring the kernel's bf16-input / f32-accum numerics.
    xc = x.astype(jnp.bfloat16).astype(jnp.float32)
    w1c = w1.astype(jnp.bfloat16).astype(jnp.float32)
    w2c = w2.astype(jnp.bfloat16).astype(jnp.float32)
    h_ref = jnp.maximum(xc @ w1c + b1[0], 0.0)
    ref = h_ref.astype(jnp.bfloat16).astype(jnp.float32) @ w2c + b2[0]

    assert out.shape == (B, T, D_OUT), out.shape
    assert jnp.allclose(out, ref, atol=1e-2, rtol=1e-2), "mismatch vs reference"

    print("KERNEL_OK")
</pallas_src>

<mosaic_0001>
module attributes {stable_mosaic.version = 11 : i64} {
  func.func @_mlp_kernel(%arg0: i32, %arg1: memref<16x768xbf16, #tpu.memory_space<vmem>>, %arg2: memref<768x256xbf16, #tpu.memory_space<vmem>>, %arg3: memref<1x256xf32, #tpu.memory_space<vmem>>, %arg4: memref<256x128xbf16, #tpu.memory_space<vmem>>, %arg5: memref<1x128xf32, #tpu.memory_space<vmem>>, %arg6: memref<16x128xf32, #tpu.memory_space<vmem>>) attributes {dimension_semantics = [#tpu.dimension_semantics<parallel>], iteration_bounds = array<i64: 1>, scalar_prefetch = 0 : i64, scratch_operands = 0 : i64, tpu.core_type = #tpu.core_type<tc>, window_params = [{transform_indices = @transform_0, window_bounds = array<i64: 16, 768>}, {pipeline_mode = #tpu.pipeline_mode<synchronous>, transform_indices = @transform_1, window_bounds = array<i64: 768, 256>}, {pipeline_mode = #tpu.pipeline_mode<synchronous>, transform_indices = @transform_2, window_bounds = array<i64: 1, 256>}, {pipeline_mode = #tpu.pipeline_mode<synchronous>, transform_indices = @transform_3, window_bounds = array<i64: 256, 128>}, {pipeline_mode = #tpu.pipeline_mode<synchronous>, transform_indices = @transform_4, window_bounds = array<i64: 1, 128>}, {transform_indices = @transform_5, window_bounds = array<i64: 16, 128>}]} {
    %c0 = arith.constant 0 : index
    %c0_0 = arith.constant 0 : index
    %0 = vector.load %arg1[%c0, %c0_0] : memref<16x768xbf16, #tpu.memory_space<vmem>>, vector<16x768xbf16>
    %c0_1 = arith.constant 0 : index
    %c0_2 = arith.constant 0 : index
    %1 = vector.load %arg2[%c0_1, %c0_2] : memref<768x256xbf16, #tpu.memory_space<vmem>>, vector<768x256xbf16>
    %cst = arith.constant dense<0.000000e+00> : vector<16x256xf32>
    %2 = tpu.matmul %0, %1, %cst {dimension_numbers = #tpu.dot_dimension_numbers<[1], [0], [0], [1], [0, 0, 1, 1], [], []>} : vector<16x768xbf16>, vector<768x256xbf16>, vector<16x256xf32> -> vector<16x256xf32>
    %c0_3 = arith.constant 0 : index
    %c0_4 = arith.constant 0 : index
    %3 = vector.load %arg3[%c0_3, %c0_4] : memref<1x256xf32, #tpu.memory_space<vmem>>, vector<1x256xf32>
    %4 = vector.broadcast %3 : vector<1x256xf32> to vector<16x256xf32>
    %5 = arith.addf %2, %4 : vector<16x256xf32>
    %cst_5 = arith.constant 0.000000e+00 : f32
    %6 = vector.broadcast %cst_5 : f32 to vector<16x256xf32>
    %7 = arith.maximumf %5, %6 : vector<16x256xf32>
    %8 = arith.truncf %7 : vector<16x256xf32> to vector<16x256xbf16>
    %c0_6 = arith.constant 0 : index
    %c0_7 = arith.constant 0 : index
    %9 = vector.load %arg4[%c0_6, %c0_7] : memref<256x128xbf16, #tpu.memory_space<vmem>>, vector<256x128xbf16>
    %cst_8 = arith.constant dense<0.000000e+00> : vector<16x128xf32>
    %10 = tpu.matmul %8, %9, %cst_8 {dimension_numbers = #tpu.dot_dimension_numbers<[1], [0], [0], [1], [0, 0, 1, 1], [], []>} : vector<16x256xbf16>, vector<256x128xbf16>, vector<16x128xf32> -> vector<16x128xf32>
    %c0_9 = arith.constant 0 : index
    %c0_10 = arith.constant 0 : index
    %11 = vector.load %arg5[%c0_9, %c0_10] : memref<1x128xf32, #tpu.memory_space<vmem>>, vector<1x128xf32>
    %12 = vector.broadcast %11 : vector<1x128xf32> to vector<16x128xf32>
    %13 = arith.addf %10, %12 : vector<16x128xf32>
    %c0_11 = arith.constant 0 : index
    %c0_12 = arith.constant 0 : index
    %14 = vector.load %arg6[%c0_11, %c0_12] : memref<16x128xf32, #tpu.memory_space<vmem>>, vector<16x128xf32>
    tpu.vector_store %arg6[%c0_11, %c0_12], %13 {strides = array<i32>} : memref<16x128xf32, #tpu.memory_space<vmem>>, vector<16x128xf32>,
    return
  }
  func.func @transform_0(%arg0: i32) -> (i32, i32) {
    %c0_i32 = arith.constant 0 : i32
    %c0_i32_0 = arith.constant 0 : i32
    return %arg0, %c0_i32 : i32, i32
  }
  func.func @transform_1(%arg0: i32) -> (i32, i32) {
    %c0_i32 = arith.constant 0 : i32
    %c0_i32_0 = arith.constant 0 : i32
    %c0_i32_1 = arith.constant 0 : i32
    return %c0_i32, %c0_i32_0 : i32, i32
  }
  func.func @transform_2(%arg0: i32) -> (i32, i32) {
    %c0_i32 = arith.constant 0 : i32
    %c0_i32_0 = arith.constant 0 : i32
    %c0_i32_1 = arith.constant 0 : i32
    return %c0_i32, %c0_i32_0 : i32, i32
  }
  func.func @transform_3(%arg0: i32) -> (i32, i32) {
    %c0_i32 = arith.constant 0 : i32
    %c0_i32_0 = arith.constant 0 : i32
    %c0_i32_1 = arith.constant 0 : i32
    return %c0_i32, %c0_i32_0 : i32, i32
  }
  func.func @transform_4(%arg0: i32) -> (i32, i32) {
    %c0_i32 = arith.constant 0 : i32
    %c0_i32_0 = arith.constant 0 : i32
    %c0_i32_1 = arith.constant 0 : i32
    return %c0_i32, %c0_i32_0 : i32, i32
  }
  func.func @transform_5(%arg0: i32) -> (i32, i32) {
    %c0_i32 = arith.constant 0 : i32
    %c0_i32_0 = arith.constant 0 : i32
    return %arg0, %c0_i32 : i32, i32
  }
}

</mosaic_0001>

<bundles_post_ra>
// kernel: base_model_forward.1
= control target key start
LH: loop header
LB: loop body
LE: loop exit
PB: predicated region body
PF: predicated region fallthrough
CT: control target
= control target key end

     0   :  { %s1668_s1 = inlined_call_operand.vmem [shape: bf16[768,256], index: 1, kind: input, shape index: {}]   ;;  %s1669_s0 = inlined_call_operand.vmem [shape: bf16[16,768], index: 0, kind: input, shape index: {}]   ;;  %s1670_s3 = inlined_call_operand.vmem [shape: bf16[256,128], index: 3, kind: input, shape index: {}]   ;;  %s1671_s2 = inlined_call_operand.vmem [shape: f32[1,256], index: 2, kind: input, shape index: {}]   ;;  %s1672_s4 = inlined_call_operand.vmem [shape: f32[1,128], index: 4, kind: input, shape index: {}]   ;;  %s1673_s5 = inlined_call_operand.vmem [shape: f32[16,128], index: 5, kind: output, shape index: {}]  }
   0x1   :  { %v1103_v0 = vld [vmem:[%s1668_s1 + $0x74] ss:$8 sps:$4 sm:$0xff]   ;;  %v1105_v1 = vld [vmem:[%s1668_s1 + $0x70] ss:$8 sps:$4 sm:$0xff]   ;;  %v1109_v4 = vld [vmem:[%s1668_s1 + $0x64] ss:$8 sps:$4 sm:$0xff]  }
   0x2   :  { %645 = vmatprep.subr.bf16.mxu0 %v1103_v0  ;;  %v1106_v2 = vld [vmem:[%s1668_s1 + $0x174] ss:$8 sps:$4 sm:$0xff]   ;;  %v1108_v3 = vld [vmem:[%s1668_s1 + $0x170] ss:$8 sps:$4 sm:$0xff]   ;;  %v1111_v5 = vld [vmem:[%s1668_s1 + $0x60] ss:$8 sps:$4 sm:$0xff]  }
   0x3   :  { %646 = vmatpush1.bf16.msra.mxu0 %v1105_v1  ;;  %688 = vmatprep.subr.bf16.mxu1 %v1106_v2  ;;  %v1112_v6 = vld [vmem:[%s1668_s1 + $0x164] ss:$8 sps:$4 sm:$0xff]   ;;  %v1114_v7 = vld [vmem:[%s1668_s1 + $0x160] ss:$8 sps:$4 sm:$0xff]   ;;  %v1115_v8 = vld [vmem:[%s1668_s1 + $0x54] ss:$8 sps:$4 sm:$0xff]  }
   0x4   :  { %689 = vmatpush1.bf16.msra.mxu1 %v1108_v3  ;;  %647 = vmatprep.subr.bf16.mxu0 %v1109_v4  ;;  %v1117_v9 = vld [vmem:[%s1668_s1 + $0x50] ss:$8 sps:$4 sm:$0xff]   ;;  %v1118_v10 = vld [vmem:[%s1668_s1 + $0x154] ss:$8 sps:$4 sm:$0xff]   ;;  %v1121_v11 = vld [vmem:[%s1668_s1 + $0x44] ss:$8 sps:$4 sm:$0xff]  }
   0x5   :  { %690 = vmatprep.subr.bf16.mxu1 %v1112_v6  ;;  %v1120_v12 = vld [vmem:[%s1668_s1 + $0x150] ss:$8 sps:$4 sm:$0xff]   ;;  %v1124_v13 = vld [vmem:[%s1668_s1 + $0x144] ss:$8 sps:$4 sm:$0xff]   ;;  %v1123_v14 = vld [vmem:[%s1668_s1 + $0x40] ss:$8 sps:$4 sm:$0xff]  }
   0x6   :  { %v1127_v15 = vld [vmem:[%s1668_s1 + $0x34] ss:$8 sps:$4 sm:$0xff]   ;;  %v1126_v16 = vld [vmem:[%s1668_s1 + $0x140] ss:$8 sps:$4 sm:$0xff]   ;;  %v1129_v18 = vld [vmem:[%s1668_s1 + $0x30] ss:$8 sps:$4 sm:$0xff]  }
   0x7   :  { %648 = vmatpush1.bf16.msra.mxu0 %v1111_v5  ;;  %v1130_v17 = vld [vmem:[%s1668_s1 + $0x134] ss:$8 sps:$4 sm:$0xff]   ;;  %v1133_v19 = vld [vmem:[%s1668_s1 + $0x24] ss:$8 sps:$4 sm:$0xff]   ;;  %v1132_v20 = vld [vmem:[%s1668_s1 + $0x130] ss:$8 sps:$4 sm:$0xff]  }
   0x8   :  { %649 = vmatprep.subr.bf16.mxu0 %v1115_v8  ;;  %691 = vmatpush1.bf16.msra.mxu1 %v1114_v7  ;;  %v1136_v21 = vld [vmem:[%s1668_s1 + $0x124] ss:$8 sps:$4 sm:$0xff]   ;;  %v1135_v22 = vld [vmem:[%s1668_s1 + $0x20] ss:$8 sps:$4 sm:$0xff]   ;;  %v1139_v23 = vld [vmem:[%s1668_s1 + $0x14] ss:$8 sps:$4 sm:$0xff]  }
   0x9   :  { %692 = vmatprep.subr.bf16.mxu1 %v1118_v10  ;;  %v1138_v24 = vld [vmem:[%s1668_s1 + $0x120] ss:$8 sps:$4 sm:$0xff]   ;;  %v1142_v25 = vld [vmem:[%s1668_s1 + $0x114] ss:$8 sps:$4 sm:$0xff]   ;;  %v1141_v26 = vld [vmem:[%s1668_s1 + $0x10] ss:$8 sps:$4 sm:$0xff]  }
   0xa   :  { %v1145_v27 = vld [vmem:[%s1668_s1 + $0x4] ss:$8 sps:$4 sm:$0xff]   ;;  %v1144_v28 = vld [vmem:[%s1668_s1 + $0x110] ss:$8 sps:$4 sm:$0xff]   ;;  %v1147_v30 = vld [vmem:[%s1668_s1] ss:$8 sps:$4 sm:$0xff]  }
   0xb   :  { %650 = vmatpush1.bf16.msra.mxu0 %v1117_v9  ;;  %v1148_v29 = vld [vmem:[%s1668_s1 + $0x104] ss:$8 sps:$4 sm:$0xff]   ;;  %v1151_v31 = vld [vmem:[%s1668_s1 + $0xf4] ss:$8 sps:$4 sm:$0xff]   ;;  %v1150_v32 = vld [vmem:[%s1668_s1 + $0x100] ss:$8 sps:$4 sm:$0xff]  }
   0xc   :  { %651 = vmatprep.subr.bf16.mxu0 %v1121_v11  ;;  %693 = vmatpush1.bf16.msra.mxu1 %v1120_v12  ;;  %v1154_v33 = vld [vmem:[%s1668_s1 + $0x1f4] ss:$8 sps:$4 sm:$0xff]   ;;  %v1153_v34 = vld [vmem:[%s1668_s1 + $0xf0] ss:$8 sps:$4 sm:$0xff]   ;;  %v1157_v35 = vld [vmem:[%s1668_s1 + $0xe4] ss:$8 sps:$4 sm:$0xff]  }
   0xd   :  { %694 = vmatprep.subr.bf16.mxu1 %v1124_v13  ;;  %v1156_v36 = vld [vmem:[%s1668_s1 + $0x1f0] ss:$8 sps:$4 sm:$0xff]   ;;  %v1160_v37 = vld [vmem:[%s1668_s1 + $0x1e4] ss:$8 sps:$4 sm:$0xff]   ;;  %v1159_v38 = vld [vmem:[%s1668_s1 + $0xe0] ss:$8 sps:$4 sm:$0xff]  }
   0xe   :  { %v1163_v39 = vld [vmem:[%s1668_s1 + $0xd4] ss:$8 sps:$4 sm:$0xff]   ;;  %v1162_v40 = vld [vmem:[%s1668_s1 + $0x1e0] ss:$8 sps:$4 sm:$0xff]   ;;  %v1165_v42 = vld [vmem:[%s1668_s1 + $0xd0] ss:$8 sps:$4 sm:$0xff]  }
   0xf   :  { %652 = vmatpush1.bf16.msra.mxu0 %v1123_v14  ;;  %v1166_v41 = vld [vmem:[%s1668_s1 + $0x1d4] ss:$8 sps:$4 sm:$0xff]   ;;  %v1169_v43 = vld [vmem:[%s1668_s1 + $0xc4] ss:$8 sps:$4 sm:$0xff]   ;;  %v1168_v44 = vld [vmem:[%s1668_s1 + $0x1d0] ss:$8 sps:$4 sm:$0xff]  }
  0x10   :  { %653 = vmatprep.subr.bf16.mxu0 %v1127_v15  ;;  %695 = vmatpush1.bf16.msra.mxu1 %v1126_v16  ;;  %v1172_v45 = vld [vmem:[%s1668_s1 + $0x1c4] ss:$8 sps:$4 sm:$0xff]   ;;  %v1171_v46 = vld [vmem:[%s1668_s1 + $0xc0] ss:$8 sps:$4 sm:$0xff]   ;;  %v1175_v48 = vld [vmem:[%s1668_s1 + $0xb4] ss:$8 sps:$4 sm:$0xff]  }
  0x11   :  { %696 = vmatprep.subr.bf16.mxu1 %v1130_v17  ;;  %v1200_v47 = vld [vmem:[%s1669_s0 + $0x4] ss:$24 sps:$4 sm:$0xff]   ;;  %v1174_v49 = vld [vmem:[%s1668_s1 + $0x1c0] ss:$8 sps:$4 sm:$0xff]   ;;  %v1177_v52 = vld [vmem:[%s1668_s1 + $0xb0] ss:$8 sps:$4 sm:$0xff]  }
  0x12   :  { %677 = vmatprep.mubr.bf16.mxu0 %v1200_v47  ;;  %v1178_v50 = vld [vmem:[%s1668_s1 + $0x1b4] ss:$8 sps:$4 sm:$0xff]   ;;  %v1207_v51 = vld [vmem:[%s1669_s0 + $0xc] ss:$24 sps:$4 sm:$0xff]   ;;  %v1180_v54 = vld [vmem:[%s1668_s1 + $0x1b0] ss:$8 sps:$4 sm:$0xff]  }
  0x13   :  { %654 = vmatpush1.bf16.msra.mxu0 %v1129_v18  ;;  %v1181_v53 = vld [vmem:[%s1668_s1 + $0xa4] ss:$8 sps:$4 sm:$0xff]   ;;  %720 = vmatprep.mubr.bf16.mxu1 %v1207_v51  ;;  %v1183_v56 = vld [vmem:[%s1668_s1 + $0xa0] ss:$8 sps:$4 sm:$0xff]   ;;  %v1187_v57 = vld [vmem:[%s1668_s1 + $0x94] ss:$8 sps:$4 sm:$0xff]  }
  0x14   :  { %655 = vmatprep.subr.bf16.mxu0 %v1133_v19  ;;  %697 = vmatpush1.bf16.msra.mxu1 %v1132_v20  ;;  %v1184_v55 = vld [vmem:[%s1668_s1 + $0x1a4] ss:$8 sps:$4 sm:$0xff]   ;;  %v1186_v58 = vld [vmem:[%s1668_s1 + $0x1a0] ss:$8 sps:$4 sm:$0xff]   ;;  %v1190_v59 = vld [vmem:[%s1668_s1 + $0x194] ss:$8 sps:$4 sm:$0xff]  }
  0x15   :  { %698 = vmatprep.subr.bf16.mxu1 %v1136_v21  ;;  %v1189_v60 = vld [vmem:[%s1668_s1 + $0x90] ss:$8 sps:$4 sm:$0xff]   ;;  %v1193_v61 = vld [vmem:[%s1668_s1 + $0x84] ss:$8 sps:$4 sm:$0xff]   ;;  %v1195_v0 = vld [vmem:[%s1668_s1 + $0x80] ss:$8 sps:$4 sm:$0xff]  }
  0x16   :  { %v1192_v62 = vld [vmem:[%s1668_s1 + $0x190] ss:$8 sps:$4 sm:$0xff]   ;;  %v1196_v63 = vld [vmem:[%s1668_s1 + $0x184] ss:$8 sps:$4 sm:$0xff]   ;;  %v1204_v1 = vld [vmem:[%s1668_s1 + $0x274] ss:$8 sps:$4 sm:$0xff]  }
  0x17   :  { %656 = vmatpush1.bf16.msra.mxu0 %v1135_v22  ;;  %v1201_v2 = vld [vmem:[%s1668_s1 + $0x180] ss:$8 sps:$4 sm:$0xff]   ;;  %v1202_v4 = vld [vmem:[%s1668_s1 + $0x270] ss:$8 sps:$4 sm:$0xff]   ;;  %v1210_v6 = vld [vmem:[%s1668_s1 + $0x264] ss:$8 sps:$4 sm:$0xff]  }
  0x18   :  { %657 = vmatprep.subr.bf16.mxu0 %v1139_v23  ;;  %699 = vmatpush1.bf16.msra.mxu1 %v1138_v24  ;;  %v1198_v3 = vld [vmem:[%s1669_s0] ss:$24 sps:$4 sm:$0xff]   ;;  %v1255_v8 = vld [vmem:[%s1669_s0 + $0x14] ss:$24 sps:$4 sm:$0xff]  }
  0x19   :  { %700 = vmatprep.subr.bf16.mxu1 %v1142_v25  ;;  %v1205_v5 = vld [vmem:[%s1669_s0 + $0x8] ss:$24 sps:$4 sm:$0xff]   ;;  %v1213_v9 = vld [vmem:[%s1668_s1 + $0x254] ss:$8 sps:$4 sm:$0xff]   ;;  %v1211_v10 = vld [vmem:[%s1668_s1 + $0x250] ss:$8 sps:$4 sm:$0xff]  }
  0x1a   :  { %v1208_v7 = vld [vmem:[%s1668_s1 + $0x260] ss:$8 sps:$4 sm:$0xff]   ;;  %v1216_v11 = vld [vmem:[%s1668_s1 + $0x244] ss:$8 sps:$4 sm:$0xff]   ;;  %v1219_v13 = vld [vmem:[%s1668_s1 + $0x234] ss:$8 sps:$4 sm:$0xff]  }
  0x1b   :  { %658 = vmatpush1.bf16.msra.mxu0 %v1141_v26  ;;  %v1214_v12 = vld [vmem:[%s1668_s1 + $0x240] ss:$8 sps:$4 sm:$0xff]   ;;  %v1217_v14 = vld [vmem:[%s1668_s1 + $0x230] ss:$8 sps:$4 sm:$0xff]   ;;  %v1222_v15 = vld [vmem:[%s1668_s1 + $0x224] ss:$8 sps:$4 sm:$0xff]  }
  0x1c   :  { %659 = vmatprep.subr.bf16.mxu0 %v1145_v27  ;;  %701 = vmatpush1.bf16.msra.mxu1 %v1144_v28  ;;  %v1220_v16 = vld [vmem:[%s1668_s1 + $0x220] ss:$8 sps:$4 sm:$0xff]   ;;  %v1225_v17 = vld [vmem:[%s1668_s1 + $0x214] ss:$8 sps:$4 sm:$0xff]   ;;  %v1223_v18 = vld [vmem:[%s1668_s1 + $0x210] ss:$8 sps:$4 sm:$0xff]  }
  0x1d   :  { %702 = vmatprep.subr.bf16.mxu1 %v1148_v29  ;;  %v1228_v19 = vld [vmem:[%s1668_s1 + $0x204] ss:$8 sps:$4 sm:$0xff]   ;;  %v1226_v20 = vld [vmem:[%s1668_s1 + $0x200] ss:$8 sps:$4 sm:$0xff]   ;;  %v1231_v21 = vld [vmem:[%s1668_s1 + $0x2f4] ss:$8 sps:$4 sm:$0xff]  }
  0x1e   :  { %v1229_v22 = vld [vmem:[%s1668_s1 + $0x2f0] ss:$8 sps:$4 sm:$0xff]   ;;  %v1234_v23 = vld [vmem:[%s1668_s1 + $0x2e4] ss:$8 sps:$4 sm:$0xff]   ;;  %v1232_v24 = vld [vmem:[%s1668_s1 + $0x2e0] ss:$8 sps:$4 sm:$0xff]  }
  0x1f   :  { %660 = vmatpush1.bf16.msra.mxu0 %v1147_v30  ;;  %v1237_v25 = vld [vmem:[%s1668_s1 + $0x2d4] ss:$8 sps:$4 sm:$0xff]   ;;  %v1235_v26 = vld [vmem:[%s1668_s1 + $0x2d0] ss:$8 sps:$4 sm:$0xff]   ;;  %v1240_v27 = vld [vmem:[%s1668_s1 + $0x2c4] ss:$8 sps:$4 sm:$0xff]  }
  0x20   :  { %661 = vmatprep.subr.bf16.mxu0 %v1151_v31  ;;  %703 = vmatpush1.bf16.msra.mxu1 %v1150_v32  ;;  %v1238_v28 = vld [vmem:[%s1668_s1 + $0x2c0] ss:$8 sps:$4 sm:$0xff]   ;;  %v1243_v29 = vld [vmem:[%s1668_s1 + $0x2b4] ss:$8 sps:$4 sm:$0xff]   ;;  %v1241_v30 = vld [vmem:[%s1668_s1 + $0x2b0] ss:$8 sps:$4 sm:$0xff]  }
  0x21   :  { %704 = vmatprep.subr.bf16.mxu1 %v1154_v33  ;;  %v1246_v31 = vld [vmem:[%s1668_s1 + $0x2a4] ss:$8 sps:$4 sm:$0xff]   ;;  %v1244_v32 = vld [vmem:[%s1668_s1 + $0x2a0] ss:$8 sps:$4 sm:$0xff]   ;;  %v1249_v33 = vld [vmem:[%s1668_s1 + $0x294] ss:$8 sps:$4 sm:$0xff]  }
  0x22   :  { %v1265_v47 = vld [vmem:[%s1670_s3 + $0x18] sm:$0xff]   ;;  %v1269_v51 = vld [vmem:[%s1670_s3 + $0x8] sm:$0xff]  }
  0x23   :  { %662 = vmatpush2.bf16.msra.mxu0 %v1153_v34  ;;  %v1247_v34 = vld [vmem:[%s1668_s1 + $0x290] ss:$8 sps:$4 sm:$0xff]  }
  0x24   :  { %663 = vmatprep.subr.bf16.mxu0 %v1157_v35  ;;  %705 = vmatpush2.bf16.msra.mxu1 %v1156_v36  ;;  %v1252_v35 = vld [vmem:[%s1668_s1 + $0x284] ss:$8 sps:$4 sm:$0xff]   ;;  %v1250_v36 = vld [vmem:[%s1668_s1 + $0x280] ss:$8 sps:$4 sm:$0xff]  }
  0x25   :  { %706 = vmatprep.subr.bf16.mxu1 %v1160_v37  ;;  %v1253_v37 = vld [vmem:[%s1669_s0 + $0x10] ss:$24 sps:$4 sm:$0xff]  }
  0x27   :  { %664 = vmatpush2.bf16.msra.mxu0 %v1159_v38  ;;  %v1256_v38 = vld [vmem:[%s1670_s3 + $0x78] sm:$0xff]  }
  0x28   :  { %665 = vmatprep.subr.bf16.mxu0 %v1163_v39  ;;  %707 = vmatpush2.bf16.msra.mxu1 %v1162_v40  ;;  %v1257_v39 = vld [vmem:[%s1670_s3 + $0x38] sm:$0xff]   ;;  %v1258_v40 = vld [vmem:[%s1670_s3 + $0x70] sm:$0xff]  }
  0x29   :  { %708 = vmatprep.subr.bf16.mxu1 %v1166_v41  ;;  %v1259_v41 = vld [vmem:[%s1670_s3 + $0x30] sm:$0xff]  }
  0x2b   :  { %666 = vmatpush2.bf16.msra.mxu0 %v1165_v42  ;;  %v1260_v42 = vld [vmem:[%s1670_s3 + $0x68] sm:$0xff]  }
  0x2c   :  { %667 = vmatprep.subr.bf16.mxu0 %v1169_v43  ;;  %709 = vmatpush2.bf16.msra.mxu1 %v1168_v44  ;;  %v1261_v43 = vld [vmem:[%s1670_s3 + $0x28] sm:$0xff]   ;;  %v1262_v44 = vld [vmem:[%s1670_s3 + $0x60] sm:$0xff]  }
  0x2d   :  { %710 = vmatprep.subr.bf16.mxu1 %v1172_v45  ;;  %v1263_v45 = vld [vmem:[%s1670_s3 + $0x20] sm:$0xff]  }
  0x2f   :  { %668 = vmatpush2.bf16.msra.mxu0 %v1171_v46  ;;  %v1264_v46 = vld [vmem:[%s1670_s3 + $0x58] sm:$0xff]  }
  0x30   :  { %669 = vmatprep.subr.bf16.mxu0 %v1175_v48  ;;  %711 = vmatpush2.bf16.msra.mxu1 %v1174_v49  ;;  %v1266_v48 = vld [vmem:[%s1670_s3 + $0x50] sm:$0xff]  }
  0x31   :  { %712 = vmatprep.subr.bf16.mxu1 %v1178_v50  ;;  %v1267_v49 = vld [vmem:[%s1670_s3 + $0x10] sm:$0xff]   ;;  %v1268_v50 = vld [vmem:[%s1670_s3 + $0x48] sm:$0xff]  }
  0x33   :  { %670 = vmatpush2.bf16.msra.mxu0 %v1177_v52  ;;  %v1270_v52 = vld [vmem:[%s1670_s3 + $0x40] sm:$0xff]  }
  0x34   :  { %671 = vmatprep.subr.bf16.mxu0 %v1181_v53  ;;  %713 = vmatpush2.bf16.msra.mxu1 %v1180_v54  ;;  %v1271_v53 = vld [vmem:[%s1670_s3] sm:$0xff]   ;;  %v125_v54 = vlaneseq }
  0x35   :  { %714 = vmatprep.subr.bf16.mxu1 %v1184_v55 }
  0x37   :  { %672 = vmatpush2.bf16.msra.mxu0 %v1183_v56  ;;  %v126_v56 = vshrl.u32 %v125_v54, 7 }
  0x38   :  { %673 = vmatprep.subr.bf16.mxu0 %v1187_v57  ;;  %715 = vmatpush2.bf16.msra.mxu1 %v1186_v58 }
  0x39   :  { %716 = vmatprep.subr.bf16.mxu1 %v1190_v59  ;;  %v131_v59 = vsub.s32 1, %v126_v56 }
  0x3b   :  { %674 = vmatpush2.bf16.msra.mxu0 %v1189_v60  ;;  %v123_v60 = vld [vmem:[%s1671_s2] sm:$0x3] }
  0x3c   :  { %675 = vmatprep.subr.bf16.mxu0 %v1193_v61  ;;  %717 = vmatpush2.bf16.msra.mxu1 %v1192_v62  ;;  %v127_v61 = vsub.s32 0, %v126_v56 }
  0x3d   :  { %718 = vmatprep.subr.bf16.mxu1 %v1196_v63 }
  0x3f   :  { %676 = vmatpush2.bf16.msra.mxu0 %v1195_v0  ;;  %v132_v0 = vrot.slane %v123_v60, %v131_v59 }
  0x40   :  { %731 = vmatprep.subr.bf16.mxu0 %v1204_v1  ;;  %719 = vmatpush2.bf16.msra.mxu1 %v1201_v2  ;;  %v128_v1 = vrot.slane %v123_v60, %v127_v61 }
  0x41   :  { %1081 = vmatprep.subr.bf16.mxu1 %v1256_v38 }
  0x42   :  { %678 = vmatmul.mubr.bf16.vlgmr.msra.gmra.mxu0 %v1198_v3 }
  0x43   :  { %732 = vmatpush1.bf16.msra.mxu0 %v1202_v4  ;;  %721 = vmatmul.mubr.bf16.vlgmr.msra.gmra.mxu1 %v1205_v5 }
  0x44   :  { %733 = vmatprep.subr.bf16.mxu0 %v1210_v6  ;;  %763 = vmatprep.mubr.bf16.mxu0 %v1255_v8 }
  0x45   :  { %1082 = vmatpush3.bf16.msra.mxu1 %v1257_v39 }
  0x46   :  { %1083 = vmatprep.subr.bf16.mxu1 %v1258_v40 }
  0x47   :  { %734 = vmatpush1.bf16.msra.mxu0 %v1208_v7 }
  0x48   :  { %735 = vmatprep.subr.bf16.mxu0 %v1213_v9 }
  0x49   :  { %1084 = vmatpush3.bf16.msra.mxu1 %v1259_v41 }
  0x4a   :  { %1085 = vmatprep.subr.bf16.mxu1 %v1260_v42 }
  0x4b   :  { %736 = vmatpush1.bf16.msra.mxu0 %v1211_v10 }
  0x4c   :  { %737 = vmatprep.subr.bf16.mxu0 %v1216_v11 }
  0x4d   :  { %1086 = vmatpush3.bf16.msra.mxu1 %v1261_v43 }
  0x4e   :  { %1087 = vmatprep.subr.bf16.mxu1 %v1262_v44 }
  0x4f   :  { %738 = vmatpush1.bf16.msra.mxu0 %v1214_v12 }
  0x50   :  { %739 = vmatprep.subr.bf16.mxu0 %v1219_v13 }
  0x51   :  { %1088 = vmatpush3.bf16.msra.mxu1 %v1263_v45 }
  0x52   :  { %1089 = vmatprep.subr.bf16.mxu1 %v1264_v46 }
  0x53   :  { %740 = vmatpush1.bf16.msra.mxu0 %v1217_v14 }
  0x54   :  { %741 = vmatprep.subr.bf16.mxu0 %v1222_v15 }
  0x55   :  { %1090 = vmatpush3.bf16.msra.mxu1 %v1265_v47 }
  0x56   :  { %1091 = vmatprep.subr.bf16.mxu1 %v1266_v48 }
  0x57   :  { %742 = vmatpush1.bf16.msra.mxu0 %v1220_v16 }
  0x58   :  { %743 = vmatprep.subr.bf16.mxu0 %v1225_v17 }
  0x59   :  { %1092 = vmatpush3.bf16.msra.mxu1 %v1267_v49 }
  0x5a   :  { %1093 = vmatprep.subr.bf16.mxu1 %v1268_v50 }
  0x5b   :  { %744 = vmatpush1.bf16.msra.mxu0 %v1223_v18 }
  0x5c   :  { %745 = vmatprep.subr.bf16.mxu0 %v1228_v19 }
  0x5d   :  { %1094 = vmatpush3.bf16.msra.mxu1 %v1269_v51 }
  0x5e   :  { %1095 = vmatprep.subr.bf16.mxu1 %v1270_v52 }
  0x5f   :  { %746 = vmatpush1.bf16.msra.mxu0 %v1226_v20 }
  0x60   :  { %747 = vmatprep.subr.bf16.mxu0 %v1231_v21 }
  0x61   :  { %1096 = vmatpush3.bf16.msra.mxu1 %v1271_v53 }
  0x63   :  { %748 = vmatpush2.bf16.msra.mxu0 %v1229_v22 }
  0x64   :  { %749 = vmatprep.subr.bf16.mxu0 %v1234_v23 }
  0x67   :  { %750 = vmatpush2.bf16.msra.mxu0 %v1232_v24 }
  0x68   :  { %751 = vmatprep.subr.bf16.mxu0 %v1237_v25 }
  0x6b   :  { %752 = vmatpush2.bf16.msra.mxu0 %v1235_v26 }
  0x6c   :  { %753 = vmatprep.subr.bf16.mxu0 %v1240_v27 }
  0x6f   :  { %754 = vmatpush2.bf16.msra.mxu0 %v1238_v28  ;;  %v1064_v28 = vld [vmem:[%s1672_s4] ss:$0 sm:$0xff] }
  0x70   :  { %755 = vmatprep.subr.bf16.mxu0 %v1243_v29 }
  0x73   :  { %756 = vmatpush2.bf16.msra.mxu0 %v1241_v30 }
  0x74   :  { %757 = vmatprep.subr.bf16.mxu0 %v1246_v31 }
  0x77   :  { %758 = vmatpush2.bf16.msra.mxu0 %v1244_v32 }
  0x78   :  { %759 = vmatprep.subr.bf16.mxu0 %v1249_v33 }
  0x7b   :  { %760 = vmatpush2.bf16.msra.mxu0 %v1247_v34 }
  0x7c   :  { %761 = vmatprep.subr.bf16.mxu0 %v1252_v35 }
  0x7f   :  { %762 = vmatpush2.bf16.msra.mxu0 %v1250_v36 }
  0x82   :  { %764 = vmatmul.mubr.bf16.vlgmr.msra.gmra.mxu0 %v1253_v37 }
 0x102   :  { %v679_v55 = vpop.f32.mrf.mxu0 }
 0x103   :  { %v722_v58 = vpop.f32.mrf.mxu1  ;;  %v680_v6 = vadd.f32 %v679_v55, %v128_v1 }
 0x104   :  { %v681_v57 = vpop.f32.mrf.mxu0 }
 0x105   :  { %v724_v63 = vpop.f32.mrf.mxu1  ;;  %v682_v4 = vadd.f32 %v681_v57, %v132_v0  ;;  %v723_v13 = vadd.f32 %v722_v58, %v680_v6 }
 0x106   :  { %v683_v62 = vpop.f32.mrf.mxu0 }
 0x107   :  { %v726_v3 = vpop.f32.mrf.mxu1  ;;  %v684_v5 = vadd.f32 %v683_v62, %v128_v1  ;;  %v725_v11 = vadd.f32 %v724_v63, %v682_v4 }
 0x108   :  { %v685_v2 = vpop.f32.mrf.mxu0 }
 0x109   :  { %v686_v8 = vadd.f32 %v685_v2, %v132_v0  ;;  %v728_v9 = vpop.f32.mrf.mxu1  ;;  %v727_v12 = vadd.f32 %v726_v3, %v684_v5 }
 0x10b   :  { %v729_v15 = vadd.f32 %v728_v9, %v686_v8 }
 0x142   :  { %v765_v7 = vpop.f32.mrf.mxu0 }
 0x143   :  { %v766_v18 = vadd.f32 %v765_v7, %v723_v13 }
 0x144   :  { %v767_v10 = vpop.f32.mrf.mxu0 }
 0x145   :  { %v768_v16 = vadd.f32 %v767_v10, %v725_v11  ;;  %v774_v24 = vmax.f32 %v766_v18, 0.0 }
 0x146   :  { %v769_v14 = vpop.f32.mrf.mxu0 }
 0x147   :  { %v770_v17 = vadd.f32 %v769_v14, %v727_v12  ;;  %v775_v22 = vmax.f32 %v768_v16, 0.0 }
 0x148   :  { %v771_v19 = vpop.f32.mrf.mxu0 }
 0x149   :  { %v772_v20 = vadd.f32 %v771_v19, %v729_v15  ;;  %v776_v21 = vmax.f32 %v770_v17, 0.0 }
 0x14b   :  { %v777_v23 = vmax.f32 %v772_v20, 0.0  ;;  %v778_v26 = vpack.c.bf16 %v776_v21, %v774_v24 }
 0x14d   :  { %v779_v25 = vpack.c.bf16 %v777_v23, %v775_v22 }
 0x14f   :  { %947 = vmatprep.mubr.bf16.mxu1 %v779_v25 }
 0x150   :  { %948 = vmatmul.mubr.bf16.vlgmr.msra.gmra.mxu1 %v778_v26 }
 0x210   :  { %v1097_v27 = vpop.f32.mrf.mxu1 }
 0x212   :  { %v1098_v29 = vpop.f32.mrf.mxu1 }
 0x213   :  { %v1099_v30 = vadd.f32 %v1098_v29, %v1097_v27 }
 0x214   :  { %v1100_v31 = vpop.f32.mrf.mxu1 }
 0x215   :  { %v950_v32 = vadd.f32 %v1099_v30, %v1064_v28 }
 0x216   :  { %v1101_v33 = vpop.f32.mrf.mxu1 }
 0x217   :  { %956 = vst [vmem:[%s1673_s5] sm:$0xff] %v950_v32  ;;  %v1102_v34 = vadd.f32 %v1101_v33, %v1100_v31 }
 0x219   :  { %v953_v35 = vadd.f32 %v1102_v34, %v1064_v28 }
 0x21b   :  { %957 = vst [vmem:[%s1673_s5 + $0x8] sm:$0xff] %v953_v35 }

</bundles_post_ra>
